<compile_context>
chip_gen: v7x
topology: tpu7x:2x2x1
jax: 0.10.0
libtpu: 0.0.40
codegen_flags: <defaults>
</compile_context>

<pallas_src>
import jax
import jax.numpy as jnp
from jax.experimental import pallas as pl
from jax.experimental.pallas import tpu as pltpu


# ---------------------------------------------------------------------------
# Kernels
# ---------------------------------------------------------------------------
def _ffn_kernel_f32_out(x_ref, w1_ref, b1_ref, w2_ref, b2_ref, o_ref):
    """f32 output: accumulate straight into the resident output block."""
    k = pl.program_id(1)

    x = x_ref[...].astype(w1_ref.dtype)                             # MXU fast path
    h = jnp.dot(x, w1_ref[...], preferred_element_type=jnp.float32)
    h = jnp.maximum(h + b1_ref[...].astype(jnp.float32), 0.0)       # [tm, tff]
    # dropout (eval mode) == identity
    partial = jnp.dot(h.astype(w2_ref.dtype), w2_ref[...],
                      preferred_element_type=jnp.float32)           # [tm, d_model]

    @pl.when(k == 0)
    def _first():
        o_ref[...] = partial

    @pl.when(k > 0)
    def _accum():
        o_ref[...] += partial

    @pl.when(k == pl.num_programs(1) - 1)
    def _finalize():
        o_ref[...] += b2_ref[...].astype(jnp.float32)


def _ffn_kernel_scratch(x_ref, w1_ref, b1_ref, w2_ref, b2_ref, o_ref, acc_ref):
    """Narrow (e.g. bf16) output: fp32 accumulation in VMEM scratch."""
    k = pl.program_id(1)

    x = x_ref[...].astype(w1_ref.dtype)
    h = jnp.dot(x, w1_ref[...], preferred_element_type=jnp.float32)
    h = jnp.maximum(h + b1_ref[...].astype(jnp.float32), 0.0)
    # dropout (eval mode) == identity
    partial = jnp.dot(h.astype(w2_ref.dtype), w2_ref[...],
                      preferred_element_type=jnp.float32)

    @pl.when(k == 0)
    def _first():
        acc_ref[...] = partial

    @pl.when(k > 0)
    def _accum():
        acc_ref[...] += partial

    @pl.when(k == pl.num_programs(1) - 1)
    def _finalize():
        o_ref[...] = (acc_ref[...]
                      + b2_ref[...].astype(jnp.float32)).astype(o_ref.dtype)


# ---------------------------------------------------------------------------
# Wrapper helpers
# ---------------------------------------------------------------------------
def _round_up(x, m):
    return (x + m - 1) // m * m


def _device_kind():
    try:
        return jax.devices()[0].device_kind.lower()
    except Exception:
        return ""


def _vmem_capacity_bytes():
    try:
        info = pltpu.get_tpu_info()
        cap = getattr(info, "vmem_capacity_bytes", None)
        if cap:
            return int(cap)
    except Exception:
        pass
    return (64 << 20) if "v7" in _device_kind() else (128 << 20)


def _default_blocks():
    """Generation-aware (tm, tff) defaults."""
    kind = _device_kind()
    if "v7" in kind:
        # 64 MiB/TC VMEM; ~620 flops/byte breakeven -> big tm, smaller tff.
        return 768, 256
    if "v5" in kind:
        # v5e: AI breakeven ~240 flops/byte; bigger tm only inflates latency.
        return 256, 512
    # v6e (128 MiB VMEM, ~650 flops/byte) and unknown chips.
    return 1024, 512


# ---------------------------------------------------------------------------
# Public entry point
# ---------------------------------------------------------------------------
def feed_forward(x, w1, b1, w2, b2, *, block_m=None, block_ff=None):
    """x: [batch, seq, d_model]; w1: [d_model, d_ff]; w2: [d_ff, d_model].

    Weights are stored transposed w.r.t. PyTorch so y = x @ W + b.
    """
    batch, seq, d_model = x.shape
    d_ff = w1.shape[1]
    assert w1.shape == (d_model, d_ff) and w2.shape == (d_ff, d_model)

    if block_m is None or block_ff is None:
        dbm, dbf = _default_blocks()
        block_m = dbm if block_m is None else block_m
        block_ff = dbf if block_ff is None else block_ff

    out_dtype = x.dtype
    # Cast x to the (possibly narrower) weight dtype: keeps both matmuls on the
    # bf16 MXU fast path and halves x DMA bytes when weights are bf16.
    if jnp.dtype(w1.dtype).itemsize < jnp.dtype(x.dtype).itemsize:
        compute_dtype = w1.dtype
    else:
        compute_dtype = x.dtype

    M = batch * seq
    x2 = x.reshape(M, d_model).astype(compute_dtype)

    it_x = jnp.dtype(compute_dtype).itemsize
    it_o = jnp.dtype(out_dtype).itemsize
    it_w = jnp.dtype(w1.dtype).itemsize
    it_b1 = jnp.dtype(b1.dtype).itemsize
    it_b2 = jnp.dtype(b2.dtype).itemsize

    # ---- d_ff chunking: pad d_ff instead of falling back to a full-d_ff block.
    tff = min(block_ff, d_ff)
    if tff >= d_ff:
        tff, d_ff_pad = d_ff, d_ff
    else:
        tff = _round_up(tff, 128)                 # lane/sublane aligned chunk
        if tff >= d_ff:
            tff, d_ff_pad = d_ff, d_ff
        else:
            d_ff_pad = _round_up(d_ff, tff)

    if d_ff_pad != d_ff:
        # zero columns of W1 / zeros of b1 / zero rows of W2 contribute exactly 0
        w1 = jnp.pad(w1, ((0, 0), (0, d_ff_pad - d_ff)))
        b1 = jnp.pad(b1, ((0, d_ff_pad - d_ff),))
        w2 = jnp.pad(w2, ((0, d_ff_pad - d_ff), (0, 0)))

    f32_out = jnp.dtype(out_dtype) == jnp.dtype(jnp.float32)

    # sublane alignment: f32 -> 8, bf16 -> 16, 1-byte -> 32 (cover x and out)
    sub = max({4: 8, 2: 16, 1: 32}.get(it_x, 8),
              {4: 8, 2: 16, 1: 32}.get(it_o, 8))

    vmem_cap = _vmem_capacity_bytes()
    budget = vmem_cap - (8 << 20)                 # physical cap minus headroom

    def tile_bytes(tm_):
        b = (2 * tm_ * d_model * it_x             # x tile (double-buffered)
             + 2 * d_model * tff * it_w           # W1 chunk
             + 2 * tff * it_b1                    # b1 chunk
             + 2 * tff * d_model * it_w           # W2 chunk
             + 2 * d_model * it_b2                # b2
             + 2 * tm_ * d_model * it_o)          # out tile
        if not f32_out:
            b += tm_ * d_model * 4                # f32 accumulator scratch
        return b

    # Real M tile; shrink until the footprint fits the physical VMEM budget.
    tm = _round_up(min(block_m, _round_up(M, sub)), sub)
    while tile_bytes(tm) > budget and tm > sub:
        tm = max(sub, _round_up(tm // 2, sub))

    M_pad = _round_up(M, tm)
    if M_pad != M:
        x2 = jnp.pad(x2, ((0, M_pad - M), (0, 0)))

    grid = (M_pad // tm, d_ff_pad // tff)
    n_m = grid[0]

    b1_2d = b1.reshape(1, d_ff_pad)
    b2_2d = b2.reshape(1, d_model)

    # Footprint already includes double buffering; add fixed headroom only.
    vmem_limit = int(min(budget, max(32 << 20, tile_bytes(tm) + (4 << 20))))

    flops = 4 * M_pad * d_model * d_ff_pad        # two matmuls
    bytes_accessed = int(
        M_pad * d_model * (it_x + it_o)                       # x + out (once)
        + n_m * 2 * d_model * d_ff_pad * it_w                 # W1+W2 per M tile
        + n_m * (d_ff_pad * it_b1 + d_model * it_b2))         # biases per M tile

    kernel = _ffn_kernel_f32_out if f32_out else _ffn_kernel_scratch
    scratch_shapes = [] if f32_out else [pltpu.VMEM((tm, d_model), jnp.float32)]

    out = pl.pallas_call(
        kernel,
        out_shape=jax.ShapeDtypeStruct((M_pad, d_model), out_dtype),
        grid_spec=pltpu.PrefetchScalarGridSpec(
            num_scalar_prefetch=0,
            grid=grid,
            in_specs=[
                pl.BlockSpec((tm, d_model), lambda i, k: (i, 0)),   # x rows
                pl.BlockSpec((d_model, tff), lambda i, k: (0, k)),  # W1 chunk
                pl.BlockSpec((1, tff), lambda i, k: (0, k)),        # b1 chunk
                pl.BlockSpec((tff, d_model), lambda i, k: (k, 0)),  # W2 chunk
                pl.BlockSpec((1, d_model), lambda i, k: (0, 0)),    # b2
            ],
            out_specs=pl.BlockSpec((tm, d_model), lambda i, k: (i, 0)),
            scratch_shapes=scratch_shapes,
        ),
        compiler_params=pltpu.CompilerParams(
            dimension_semantics=("parallel", "arbitrary"),
            vmem_limit_bytes=vmem_limit,
        ),
        cost_estimate=pl.CostEstimate(
            flops=flops, transcendentals=0, bytes_accessed=bytes_accessed),
    )(x2, w1, b1_2d, w2, b2_2d)

    if M_pad != M:
        out = out[:M]
    return out.reshape(batch, seq, d_model)


def init_params(key, d_model, d_ff, dtype=jnp.float32):
    """Deterministic init mimicking nn.Linear defaults (uniform +/- 1/sqrt(fan_in))."""
    k1, k2, k3, k4 = jax.random.split(key, 4)
    bound1 = 1.0 / (d_model ** 0.5)
    bound2 = 1.0 / (d_ff ** 0.5)
    # stored already transposed: y = x @ W + b
    w1 = jax.random.uniform(k1, (d_model, d_ff), dtype, -bound1, bound1)
    b1 = jax.random.uniform(k2, (d_ff,), dtype, -bound1, bound1)
    w2 = jax.random.uniform(k3, (d_ff, d_model), dtype, -bound2, bound2)
    b2 = jax.random.uniform(k4, (d_model,), dtype, -bound2, bound2)
    return w1, b1, w2, b2


if __name__ == "__main__":
    batch, seq, d_model, d_ff = 2, 8, 32, 64

    key = jax.random.PRNGKey(0)
    kx, kx2, kp, kp2 = jax.random.split(key, 4)
    x = jax.random.normal(kx, (batch, seq, d_model), jnp.float32)
    w1, b1, w2, b2 = init_params(kp, d_model, d_ff)

    # reference in plain JAX (eval-mode dropout == identity)
    ref = jnp.maximum(x @ w1 + b1, 0.0) @ w2 + b2

    # 1) default (generation-aware) tiles
    out = jax.block_until_ready(feed_forward(x, w1, b1, w2, b2))
    assert out.shape == (batch, seq, d_model)
    assert jnp.allclose(out, ref, atol=1e-5, rtol=1e-5)

    # 2) chunked d_ff (k > 0 accumulation path) + small M tile
    d_ff2 = 256
    w1b, b1b, w2b, b2b = init_params(kp2, d_model, d_ff2)
    ref2 = jnp.maximum(x @ w1b + b1b, 0.0) @ w2b + b2b
    out2 = jax.block_until_ready(
        feed_forward(x, w1b, b1b, w2b, b2b, block_m=8, block_ff=128))
    assert jnp.allclose(out2, ref2, atol=1e-5, rtol=1e-5)

    # 3) zero-padded d_ff path (d_ff not a multiple of the 128-aligned chunk)
    d_ff3 = 192
    w1c, b1c, w2c, b2c = init_params(kp2, d_model, d_ff3)
    ref3 = jnp.maximum(x @ w1c + b1c, 0.0) @ w2c + b2c
    out3 = jax.block_until_ready(
        feed_forward(x, w1c, b1c, w2c, b2c, block_m=8, block_ff=128))
    assert jnp.allclose(out3, ref3, atol=1e-5, rtol=1e-5)

    # 4) M-padding path (M not a multiple of the tile)
    x4 = jax.random.normal(kx2, (2, 5, d_model), jnp.float32)
    ref4 = jnp.maximum(x4 @ w1 + b1, 0.0) @ w2 + b2
    out4 = jax.block_until_ready(feed_forward(x4, w1, b1, w2, b2))
    assert jnp.allclose(out4, ref4, atol=1e-5, rtol=1e-5)

    # 5) bf16 weight fast path (wrapper casts x to bf16; f32 output path)
    out5 = jax.block_until_ready(
        feed_forward(x, w1.astype(jnp.bfloat16), b1, w2.astype(jnp.bfloat16), b2))
    assert jnp.allclose(out5, ref, atol=5e-2, rtol=5e-2)

    print("KERNEL_OK")
</pallas_src>

<mosaic_0001>
module attributes {stable_mosaic.version = 11 : i64} {
  func.func @_ffn_kernel_f32_out(%arg0: i32, %arg1: i32, %arg2: memref<16x32xf32, #tpu.memory_space<vmem>>, %arg3: memref<32x64xf32, #tpu.memory_space<vmem>>, %arg4: memref<1x64xf32, #tpu.memory_space<vmem>>, %arg5: memref<64x32xf32, #tpu.memory_space<vmem>>, %arg6: memref<1x32xf32, #tpu.memory_space<vmem>>, %arg7: memref<16x32xf32, #tpu.memory_space<vmem>>) attributes {dimension_semantics = [#tpu.dimension_semantics<parallel>, #tpu.dimension_semantics<arbitrary>], iteration_bounds = array<i64: 1, 1>, scalar_prefetch = 0 : i64, scratch_operands = 0 : i64, tpu.core_type = #tpu.core_type<tc>, window_params = [{transform_indices = @transform_0, window_bounds = array<i64: 16, 32>}, {transform_indices = @transform_1, window_bounds = array<i64: 32, 64>}, {transform_indices = @transform_2, window_bounds = array<i64: 1, 64>}, {transform_indices = @transform_3, window_bounds = array<i64: 64, 32>}, {pipeline_mode = #tpu.pipeline_mode<synchronous>, transform_indices = @transform_4, window_bounds = array<i64: 1, 32>}, {transform_indices = @transform_5, window_bounds = array<i64: 16, 32>}]} {
    %c0 = arith.constant 0 : index
    %c0_0 = arith.constant 0 : index
    %0 = vector.load %arg2[%c0, %c0_0] : memref<16x32xf32, #tpu.memory_space<vmem>>, vector<16x32xf32>
    %c0_1 = arith.constant 0 : index
    %c0_2 = arith.constant 0 : index
    %1 = vector.load %arg3[%c0_1, %c0_2] : memref<32x64xf32, #tpu.memory_space<vmem>>, vector<32x64xf32>
    %cst = arith.constant dense<0.000000e+00> : vector<16x64xf32>
    %2 = tpu.matmul %0, %1, %cst {dimension_numbers = #tpu.dot_dimension_numbers<[1], [0], [0], [1], [0, 0, 1, 1], [], []>} : vector<16x32xf32>, vector<32x64xf32>, vector<16x64xf32> -> vector<16x64xf32>
    %c0_3 = arith.constant 0 : index
    %c0_4 = arith.constant 0 : index
    %3 = vector.load %arg4[%c0_3, %c0_4] : memref<1x64xf32, #tpu.memory_space<vmem>>, vector<1x64xf32>
    %4 = vector.broadcast %3 : vector<1x64xf32> to vector<16x64xf32>
    %5 = arith.addf %2, %4 : vector<16x64xf32>
    %cst_5 = arith.constant 0.000000e+00 : f32
    %6 = vector.broadcast %cst_5 : f32 to vector<16x64xf32>
    %7 = arith.maximumf %5, %6 : vector<16x64xf32>
    %c0_6 = arith.constant 0 : index
    %c0_7 = arith.constant 0 : index
    %8 = vector.load %arg5[%c0_6, %c0_7] : memref<64x32xf32, #tpu.memory_space<vmem>>, vector<64x32xf32>
    %cst_8 = arith.constant dense<0.000000e+00> : vector<16x32xf32>
    %9 = tpu.matmul %7, %8, %cst_8 {dimension_numbers = #tpu.dot_dimension_numbers<[1], [0], [0], [1], [0, 0, 1, 1], [], []>} : vector<16x64xf32>, vector<64x32xf32>, vector<16x32xf32> -> vector<16x32xf32>
    %c0_i32 = arith.constant 0 : i32
    %10 = arith.cmpi eq, %arg1, %c0_i32 : i32
    %11 = arith.extui %10 : i1 to i32
    %c0_i32_9 = arith.constant 0 : i32
    %12 = arith.cmpi ne, %11, %c0_i32_9 : i32
    scf.if %12 {
      %c0_14 = arith.constant 0 : index
      %c0_15 = arith.constant 0 : index
      %19 = vector.load %arg7[%c0_14, %c0_15] : memref<16x32xf32, #tpu.memory_space<vmem>>, vector<16x32xf32>
      tpu.vector_store %arg7[%c0_14, %c0_15], %9 {strides = array<i32>} : memref<16x32xf32, #tpu.memory_space<vmem>>, vector<16x32xf32>,
    } else {
    }
    %c0_i32_10 = arith.constant 0 : i32
    %13 = arith.cmpi sgt, %arg1, %c0_i32_10 : i32
    %14 = arith.extui %13 : i1 to i32
    %c0_i32_11 = arith.constant 0 : i32
    %15 = arith.cmpi ne, %14, %c0_i32_11 : i32
    scf.if %15 {
      %c0_14 = arith.constant 0 : index
      %c0_15 = arith.constant 0 : index
      %19 = vector.load %arg7[%c0_14, %c0_15] : memref<16x32xf32, #tpu.memory_space<vmem>>, vector<16x32xf32>
      %20 = arith.addf %19, %9 : vector<16x32xf32>
      %c0_16 = arith.constant 0 : index
      %c0_17 = arith.constant 0 : index
      %21 = vector.load %arg7[%c0_16, %c0_17] : memref<16x32xf32, #tpu.memory_space<vmem>>, vector<16x32xf32>
      tpu.vector_store %arg7[%c0_16, %c0_17], %20 {strides = array<i32>} : memref<16x32xf32, #tpu.memory_space<vmem>>, vector<16x32xf32>,
    } else {
    }
    %c0_i32_12 = arith.constant 0 : i32
    %16 = arith.cmpi eq, %arg1, %c0_i32_12 : i32
    %17 = arith.extui %16 : i1 to i32
    %c0_i32_13 = arith.constant 0 : i32
    %18 = arith.cmpi ne, %17, %c0_i32_13 : i32
    scf.if %18 {
      %c0_14 = arith.constant 0 : index
      %c0_15 = arith.constant 0 : index
      %19 = vector.load %arg7[%c0_14, %c0_15] : memref<16x32xf32, #tpu.memory_space<vmem>>, vector<16x32xf32>
      %c0_16 = arith.constant 0 : index
      %c0_17 = arith.constant 0 : index
      %20 = vector.load %arg6[%c0_16, %c0_17] : memref<1x32xf32, #tpu.memory_space<vmem>>, vector<1x32xf32>
      %21 = vector.broadcast %20 : vector<1x32xf32> to vector<16x32xf32>
      %22 = arith.addf %19, %21 : vector<16x32xf32>
      %c0_18 = arith.constant 0 : index
      %c0_19 = arith.constant 0 : index
      %23 = vector.load %arg7[%c0_18, %c0_19] : memref<16x32xf32, #tpu.memory_space<vmem>>, vector<16x32xf32>
      tpu.vector_store %arg7[%c0_18, %c0_19], %22 {strides = array<i32>} : memref<16x32xf32, #tpu.memory_space<vmem>>, vector<16x32xf32>,
    } else {
    }
    return
  }
  func.func @transform_0(%arg0: i32, %arg1: i32) -> (i32, i32) {
    %c0_i32 = arith.constant 0 : i32
    %c0_i32_0 = arith.constant 0 : i32
    return %arg0, %c0_i32 : i32, i32
  }
  func.func @transform_1(%arg0: i32, %arg1: i32) -> (i32, i32) {
    %c0_i32 = arith.constant 0 : i32
    %c0_i32_0 = arith.constant 0 : i32
    return %c0_i32, %arg1 : i32, i32
  }
  func.func @transform_2(%arg0: i32, %arg1: i32) -> (i32, i32) {
    %c0_i32 = arith.constant 0 : i32
    %c0_i32_0 = arith.constant 0 : i32
    return %c0_i32, %arg1 : i32, i32
  }
  func.func @transform_3(%arg0: i32, %arg1: i32) -> (i32, i32) {
    %c0_i32 = arith.constant 0 : i32
    %c0_i32_0 = arith.constant 0 : i32
    return %arg1, %c0_i32 : i32, i32
  }
  func.func @transform_4(%arg0: i32, %arg1: i32) -> (i32, i32) {
    %c0_i32 = arith.constant 0 : i32
    %c0_i32_0 = arith.constant 0 : i32
    %c0_i32_1 = arith.constant 0 : i32
    return %c0_i32, %c0_i32_0 : i32, i32
  }
  func.func @transform_5(%arg0: i32, %arg1: i32) -> (i32, i32) {
    %c0_i32 = arith.constant 0 : i32
    %c0_i32_0 = arith.constant 0 : i32
    return %arg0, %c0_i32 : i32, i32
  }
}

</mosaic_0001>

<bundles_post_ra>
// kernel: tpu_custom_call.1
= control target key start
LH: loop header
LB: loop body
LE: loop exit
PB: predicated region body
PF: predicated region fallthrough
CT: control target
= control target key end

     0   :  { %vm34_vm0 = vcmask 261120   ;;  %s458_s0 = inlined_call_operand.vmem [shape: f32[16,32], index: 0, kind: input, shape index: {}]   ;;  %s459_s1 = inlined_call_operand.vmem [shape: f32[32,64], index: 1, kind: input, shape index: {}]   ;;  %s460_s2 = inlined_call_operand.vmem [shape: f32[1,64], index: 2, kind: input, shape index: {}]   ;;  %s461_s3 = inlined_call_operand.vmem [shape: f32[64,32], index: 3, kind: input, shape index: {}]   ;;  %s462_s4 = inlined_call_operand.vmem [shape: f32[1,32], index: 4, kind: input, shape index: {}]   ;;  %s463_s5 = inlined_call_operand.hbm [shape: f32[16,32], index: 5, kind: output, shape index: {}]  }
   0x1   :  { %v23_v0 = vld [vmem:[%s459_s1] sm:$0xff]  ;;  %v24_v1 = vld [vmem:[%s459_s1 + $0x8] sm:$0xff]  ;;  %v25_v2 = vld [vmem:[%s459_s1 + $0x10] sm:$0xff] }
   0x2   :  { %v308_v3 = vpack.c.bf16 %v24_v1, %v23_v0  ;;  %v26_v4 = vld [vmem:[%s459_s1 + $0x18] sm:$0xff]  ;;  %v21_v5 = vld [vmem:[%s458_s0] sm:$0xff]  ;;  %v119_v8 = vld [vmem:[%s461_s3 + $0x8] sm:$0xff] }
   0x3   :  { %v312_v6 = vpack.c.bf16 %v26_v4, %v25_v2  ;;  %286 = vmatprep.mubr.msk.f32.mxu0 %vm34_vm0, %v21_v5  ;;  %v118_v7 = vld [vmem:[%s461_s3] sm:$0xff]  ;;  %v120_v9 = vld [vmem:[%s461_s3 + $0x10] sm:$0xff]  ;;  %v121_v11 = vld [vmem:[%s461_s3 + $0x18] sm:$0xff] }
   0x4   :  { %309 = vmatprep.subr.bf16.mxu0 %v308_v3  ;;  %v316_v10 = vpack.c.bf16 %v119_v8, %v118_v7  ;;  %v320_v12 = vpack.c.bf16 %v121_v11, %v120_v9  ;;  %v122_v13 = vld [vmem:[%s461_s3 + $0x20] sm:$0xff]  ;;  %v123_v14 = vld [vmem:[%s461_s3 + $0x28] sm:$0xff] }
   0x5   :  { %311 = vmatpush3.bf16.msra.mxu0 %v308_v3 }
   0x6   :  { %10 = vsyncpa [#allocation3], 0  ;;  %313 = vmatprep.subr.bf16.mxu0 %v312_v6  ;;  %317 = vmatprep.subr.bf16.mxu1 %v316_v10  ;;  %v324_v15 = vpack.c.bf16 %v123_v14, %v122_v13  ;;  %v22_v16 = vld [vmem:[%s458_s0 + $0x8] sm:$0xff]  ;;  %v124_v17 = vld [vmem:[%s461_s3 + $0x30] sm:$0xff]  ;;  %vm126_vm1 = vcmask 523264  }
   0x7   :  { %319 = vmatpush3.bf16.msra.mxu1 %v316_v10  ;;  %v125_v18 = vld [vmem:[%s461_s3 + $0x38] sm:$0xff]  ;;  %v256_v20 = vld [vmem:[%s460_s2] ss:$0 sm:$0xff]  ;;  %s359_s2 = smov [#allocation2]  }
   0x8   :  { %321 = vmatprep.subr.bf16.mxu1 %v320_v12  ;;  %v328_v19 = vpack.c.bf16 %v125_v18, %v124_v17  ;;  %v261_v29 = vld [vmem:[%s462_s4] ss:$0 sm:$0xff]  ;;  %s245_s22 = sshll.u32 %s359_s2, 4  ;;  %s246_s22 = int_to_ptr.vmem [resolvable:$true] %s245_s22 }
   0x9   :  { %315 = vmatpush3.bf16.msra.mxu0 %v312_v6  ;;  %s335_s23 = scalar_lea.vmem %s246_s22, 256  ;;  %p340_p1 = scmp.lt.s32.totalorder %s246_s22, %s246_s22 }
   0xa   :  { %p336_p0 = scmp.ne.s32.totalorder %s246_s22, %s335_s23  ;;  %p341_p2 = scmp.lt.s32.totalorder %s335_s23, %s335_s23 }
   0xb   :  { %323 = vmatpush3.bf16.msra.mxu1 %v320_v12 }
   0xc   :  { %287 = vmatmul.mubr.msk.f32.vlgmr.msra.gmra.mrb[0].mxu0 %vm34_vm0, %v22_v16  ;;  %325 = vmatprep.subr.bf16.mxu1 %v324_v15  ;;  %p342_p3 = por %p341_p2, %p340_p1 }
   0xe   :  { %p343_p4 = pnand %p342_p3, %p336_p0 }
   0xf   :  { %327 = vmatpush3.bf16.msra.mxu1 %v324_v15 }
  0x10   :  { %329 = vmatprep.subr.bf16.mxu1 %v328_v19 }
  0x13   :  { %331 = vmatpush3.bf16.msra.mxu1 %v328_v19 }
  0xdf   :  { %v288_v21 = vpop.f32.mrb[0].mxu0 }
  0xe0   :  { %v113_v22 = vadd.f32 %v288_v21, %v256_v20  ;;  %v107_v23 = vpop.f32.mrb[1].mxu0 }
  0xe1   :  { %v108_v24 = vadd.f32 %v256_v20, %v107_v23 }
  0xe2   :  { %v117_v26 = vmax.f32 %v113_v22, 0.0 }
  0xe3   :  { %v116_v25 = vmax.f32 %v108_v24, 0.0 }
  0xe5   :  { %305 = vmatprep.mubr.msk.f32.mxu1 %vm126_vm1, %v116_v25 }
  0xe6   :  { %306 = vmatmul.mubr.msk.f32.vlgmr.msra.gmra.mrb[0].mxu1 %vm126_vm1, %v117_v26 }
 0x1b9   :  { %v307_v27 = vpop.f32.mrb[0].mxu1 }
 0x1ba   :  { %213 = vst.msk [vmem:[#allocation2 + $0x8] sm:$0xff] %vm34_vm0, %v307_v27  ;;  %v199_v28 = vpop.f32.mrb[1].mxu1 }
 0x1bb   :  { %212 = vst.msk [vmem:[#allocation2] sm:$0xff] %vm34_vm0, %v199_v28 }
 0x1c1   :  { %v228_v30 = vld [vmem:[#allocation2 + $0x8] sm:$0xff] }
 0x1c2   :  { %v237_v31 = vadd.f32 %v261_v29, %v228_v30  ;;  %v227_v32 = vld [vmem:[#allocation2] sm:$0xff] }
 0x1c3   :  { %v236_v33 = vadd.f32 %v261_v29, %v227_v32 }
 0x1c4   :  { %239 = vst.msk [vmem:[#allocation2 + $0x8] sm:$0xff] %vm34_vm0, %v237_v31 }
 0x1c5   :  { %238 = vst.msk [vmem:[#allocation2] sm:$0xff] %vm34_vm0, %v236_v33 }
 0x1c6   :  { %346 = shalt.err (!%p343_p4)
}
 0x1c7   :  { %s347_s25 = scalar_lea.hbm %s463_s5, 256 }
 0x1c8   :  { %p348_p5 = scmp.ne.s32.totalorder %s463_s5, %s347_s25  ;;  %p351_p6 = scmp.lt.u32.totalorder %s347_s25, %s463_s5 }
 0x1ca   :  { %p353_p7 = pnand %p351_p6, %p348_p5 }
 0x1cc   :  { %356 = shalt.err (!%p353_p7)
}
 0x1cd   :  { %s360_s30 = smov 128   ;;  %s361_s6 = smov 8  }
 0x1ce   :  { %251 = dma.vmem_to_hbm [thread:$0]  %s246_s22, 256, %s463_s5, [#allocation3], %s360_s30, %s360_s30, %s361_s6  }
 0x1cf   :  { %357 = dma.done.wait [#allocation3], 256  }
 0x1d0   :  { %358 = vsyncadd [#allocation3], 4294967040 }
 0x1d1   :  { %255 = vsyncpa [#allocation3], 1 }

</bundles_post_ra>
